<compile_context>
chip_gen: v5e
topology: v5e:2x2
jax: 0.10.0
libtpu: 0.0.40
codegen_flags: <defaults>
</compile_context>

<pallas_src>
import jax
import jax.numpy as jnp
from jax import lax
from jax.experimental import pallas as pl
from jax.experimental.pallas import tpu as pltpu


def _round_up(x, m):
    return (x + m - 1) // m * m


# ------------------------------ Pallas kernel --------------------------------


def _conv1d_relu_kernel(x_ref, w_ref, b_ref, o_ref):
    """Fused Conv1d (stride 1) + bias + ReLU on one (batch, L-tile) block.

    x_ref: (1, 1, C_in, tile_l + K - 1)   halo'd NCL input slab
    w_ref: (K, C_out, C_in)               per-tap weights (resident in VMEM)
    b_ref: (C_out, 1)                     bias, f32 (resident)
    o_ref: (1, C_out, tile_l)             NCL output tile; lanes carry L
    """
    c_out, tile_l = o_ref.shape[1], o_ref.shape[2]
    k_taps = w_ref.shape[0]
    xv = x_ref[0, 0]                                   # (C_in, tile_l + K - 1)
    acc = jnp.zeros((c_out, tile_l), jnp.float32)
    for kk in range(k_taps):                           # static unroll, K small
        acc = acc + jnp.dot(w_ref[kk], xv[:, kk:kk + tile_l],
                            preferred_element_type=jnp.float32)
    o_ref[0] = jnp.maximum(acc + b_ref[...], 0.0).astype(o_ref.dtype)


# ------------------------------ tiling helper ---------------------------------


def _choose_tile_l(n_batch, l_out, c_in, c_out, k, itemsize):
    """L tile (lane dim): full L_out when it fits; otherwise a multiple of 128
    giving >= ~8 total grid steps (2 TCs x >=2 pipelined steps each), capped by
    a v7x-safe VMEM budget (double-buffered x/out blocks + resident weights)."""
    max_tile = 2048
    if l_out <= 256:
        tile_l = l_out
    else:
        want_tiles = pl.cdiv(8, max(n_batch, 1))
        tile_l = min(max_tile, _round_up(pl.cdiv(l_out, want_tiles), 128))
        if tile_l >= l_out:
            tile_l = l_out

    def vmem_bytes(t):
        x_blk = c_in * (t + k - 1) * itemsize
        o_blk = c_out * t * max(itemsize, 4)           # out block + f32 acc
        w_res = k * c_out * c_in * itemsize + c_out * 4
        return 2 * (x_blk + o_blk) + w_res

    budget = 24 << 20                                  # safe under v7x 64 MiB
    while vmem_bytes(tile_l) > budget and tile_l > 256:
        tile_l = max(256, _round_up(tile_l // 2, 128))
        if tile_l >= l_out:
            tile_l = l_out
            break
    return tile_l, vmem_bytes(tile_l)


# -------------------------------- wrapper ------------------------------------


def conv1d_relu(x, weight, bias, *, stride=1, padding=0):
    """convLayerIndReLU.forward: ReLU(Conv1d(x)).

    x:      (N, C_in, L)        NCL (PyTorch layout)
    weight: (C_out, C_in, K)    PyTorch Conv1d layout
    bias:   (C_out,)
    returns (N, C_out, L_out)   NCL, L_out = (L + 2*padding - K)//stride + 1
    """
    n, c_in, l_in = x.shape
    c_out, c_in_w, k = weight.shape
    assert c_in == c_in_w, (c_in, c_in_w)
    # TODO(synk): groups=1, dilation=1 (nn.Conv1d defaults) are assumed.

    if padding:
        x = jnp.pad(x, ((0, 0), (0, 0), (padding, padding)))
    l_pad = l_in + 2 * padding
    if l_pad < k:
        raise ValueError(f"input length {l_in} (+2*{padding} pad) < kernel {k}")
    l_out = (l_pad - k) // stride + 1

    if stride != 1:
        # Reduce to an equivalent stride-1, kernel-size-1 problem with K*C_in
        # channels via K shifted strided slices (no gather; ~1x HBM pass).
        cols = [x[:, :, kk: kk + (l_out - 1) * stride + 1: stride]
                for kk in range(k)]
        x = jnp.concatenate(cols, axis=1)               # (N, K*C_in, L_out)
        weight = jnp.transpose(weight, (0, 2, 1)).reshape(c_out, k * c_in, 1)
        c_in, k, l_pad = k * c_in, 1, l_out

    out_dtype = x.dtype
    itemsize = jnp.dtype(out_dtype).itemsize
    tile_l, vmem_est = _choose_tile_l(n, l_out, c_in, c_out, k, itemsize)
    num_tiles = pl.cdiv(l_out, tile_l)
    win = tile_l + (k - 1)

    # Halo'd per-tile input view: (N, num_tiles, C_in, tile_l + K - 1).
    # Single tile: a pure reshape (no copy).  Multi tile: one ~1x stacking pass
    # (the K-1 element halo duplication is negligible) -- this replaces the old
    # gather-based, Kx-inflated im2col matrix and the standalone pad pass.
    if num_tiles == 1:
        x_view = x[:, None, :, :]                       # win == l_pad here
    else:
        need = (num_tiles - 1) * tile_l + win
        if need > l_pad:
            x = jnp.pad(x, ((0, 0), (0, 0), (0, need - l_pad)))
        x_view = jnp.stack(
            [x[:, :, j * tile_l: j * tile_l + win] for j in range(num_tiles)],
            axis=1)

    w_taps = jnp.transpose(weight, (2, 0, 1)).astype(out_dtype)  # (K, C_out, C_in)
    b_col = bias.astype(jnp.float32).reshape(c_out, 1)

    cparams = dict(dimension_semantics=("parallel", "parallel"))
    if vmem_est > (30 << 20):        # normally prevented by the tile_l cap
        cparams["vmem_limit_bytes"] = int(min(vmem_est + (8 << 20), 100 << 20))

    return pl.pallas_call(
        _conv1d_relu_kernel,
        out_shape=jax.ShapeDtypeStruct((n, c_out, l_out), out_dtype),
        grid=(n, num_tiles),
        in_specs=[
            pl.BlockSpec((1, 1, c_in, win), lambda b, j: (b, j, 0, 0)),
            pl.BlockSpec((k, c_out, c_in), lambda b, j: (0, 0, 0)),
            pl.BlockSpec((c_out, 1), lambda b, j: (0, 0)),
        ],
        out_specs=pl.BlockSpec((1, c_out, tile_l), lambda b, j: (b, 0, j)),
        compiler_params=pltpu.CompilerParams(**cparams),
    )(x_view, w_taps, b_col)


# ------------------------------- reference -----------------------------------


def ref_forward(x, weight, bias, *, stride=1, padding=0):
    y = lax.conv_general_dilated(
        x, weight, window_strides=(stride,), padding=[(padding, padding)],
        dimension_numbers=("NCH", "OIH", "NCH"))
    return jnp.maximum(y + bias[None, :, None], 0.0)


# --------------------------------- main ---------------------------------------


if __name__ == "__main__":
    # convLayerIndReLU(in_channels=4, out_channels=32, kernel_size=3)
    in_channels, out_channels, kernel_size = 4, 32, 3
    batch, seq_len = 2, 16

    key = jax.random.PRNGKey(0)
    kx, kw, kb = jax.random.split(key, 3)
    x = jax.random.normal(kx, (batch, in_channels, seq_len), jnp.float32)  # NCL

    fan_in = in_channels * kernel_size
    bound = 1.0 / (fan_in ** 0.5)
    weight = jax.random.uniform(kw, (out_channels, in_channels, kernel_size),
                                jnp.float32, -bound, bound)
    bias = jax.random.uniform(kb, (out_channels,), jnp.float32, -bound, bound)

    out = jax.block_until_ready(conv1d_relu(x, weight, bias))

    ref = jax.block_until_ready(ref_forward(x, weight, bias))
    l_out = seq_len - kernel_size + 1
    assert out.shape == (batch, out_channels, l_out), out.shape
    assert jnp.allclose(out, ref, atol=1e-5, rtol=1e-5), (
        float(jnp.max(jnp.abs(out - ref))))

    print("KERNEL_OK")
</pallas_src>

<mosaic_0001>
module attributes {stable_mosaic.version = 11 : i64} {
  func.func @_conv1d_relu_kernel(%arg0: i32, %arg1: i32, %arg2: memref<1x1x4x16xf32, #tpu.memory_space<vmem>>, %arg3: memref<3x32x4xf32, #tpu.memory_space<vmem>>, %arg4: memref<32x1xf32, #tpu.memory_space<vmem>>, %arg5: memref<1x32x14xf32, #tpu.memory_space<vmem>>) attributes {dimension_semantics = [#tpu.dimension_semantics<parallel>, #tpu.dimension_semantics<parallel>], iteration_bounds = array<i64: 2, 1>, scalar_prefetch = 0 : i64, scratch_operands = 0 : i64, tpu.core_type = #tpu.core_type<tc>, window_params = [{transform_indices = @transform_0, window_bounds = array<i64: 1, 1, 4, 16>}, {pipeline_mode = #tpu.pipeline_mode<synchronous>, transform_indices = @transform_1, window_bounds = array<i64: 3, 32, 4>}, {pipeline_mode = #tpu.pipeline_mode<synchronous>, transform_indices = @transform_2, window_bounds = array<i64: 32, 1>}, {transform_indices = @transform_3, window_bounds = array<i64: 1, 32, 14>}]} {
    %c0 = arith.constant 0 : index
    %c0_0 = arith.constant 0 : index
    %c0_1 = arith.constant 0 : index
    %c0_2 = arith.constant 0 : index
    %0 = vector.load %arg2[%c0, %c0_0, %c0_1, %c0_2] : memref<1x1x4x16xf32, #tpu.memory_space<vmem>>, vector<1x1x4x16xf32>
    %1 = vector.shape_cast %0 : vector<1x1x4x16xf32> to vector<4x16xf32>
    %cst = arith.constant 0.000000e+00 : f32
    %2 = vector.broadcast %cst : f32 to vector<32x14xf32>
    %c0_3 = arith.constant 0 : index
    %c0_4 = arith.constant 0 : index
    %c0_5 = arith.constant 0 : index
    %3 = vector.load %arg3[%c0_3, %c0_4, %c0_5] : memref<3x32x4xf32, #tpu.memory_space<vmem>>, vector<1x32x4xf32>
    %4 = vector.shape_cast %3 : vector<1x32x4xf32> to vector<32x4xf32>
    %5 = vector.extract_strided_slice %1 {offsets = [0, 0], sizes = [4, 14], strides = [1, 1]} : vector<4x16xf32> to vector<4x14xf32>
    %cst_6 = arith.constant dense<0.000000e+00> : vector<32x14xf32>
    %6 = tpu.matmul %4, %5, %cst_6 {dimension_numbers = #tpu.dot_dimension_numbers<[1], [0], [0], [1], [0, 0, 1, 1], [], []>} : vector<32x4xf32>, vector<4x14xf32>, vector<32x14xf32> -> vector<32x14xf32>
    %7 = arith.addf %2, %6 : vector<32x14xf32>
    %c1 = arith.constant 1 : index
    %c0_7 = arith.constant 0 : index
    %c0_8 = arith.constant 0 : index
    %8 = vector.load %arg3[%c1, %c0_7, %c0_8] : memref<3x32x4xf32, #tpu.memory_space<vmem>>, vector<1x32x4xf32>
    %9 = vector.shape_cast %8 : vector<1x32x4xf32> to vector<32x4xf32>
    %10 = vector.extract_strided_slice %1 {offsets = [0, 1], sizes = [4, 14], strides = [1, 1]} : vector<4x16xf32> to vector<4x14xf32>
    %cst_9 = arith.constant dense<0.000000e+00> : vector<32x14xf32>
    %11 = tpu.matmul %9, %10, %cst_9 {dimension_numbers = #tpu.dot_dimension_numbers<[1], [0], [0], [1], [0, 0, 1, 1], [], []>} : vector<32x4xf32>, vector<4x14xf32>, vector<32x14xf32> -> vector<32x14xf32>
    %12 = arith.addf %7, %11 : vector<32x14xf32>
    %c2 = arith.constant 2 : index
    %c0_10 = arith.constant 0 : index
    %c0_11 = arith.constant 0 : index
    %13 = vector.load %arg3[%c2, %c0_10, %c0_11] : memref<3x32x4xf32, #tpu.memory_space<vmem>>, vector<1x32x4xf32>
    %14 = vector.shape_cast %13 : vector<1x32x4xf32> to vector<32x4xf32>
    %15 = vector.extract_strided_slice %1 {offsets = [0, 2], sizes = [4, 14], strides = [1, 1]} : vector<4x16xf32> to vector<4x14xf32>
    %cst_12 = arith.constant dense<0.000000e+00> : vector<32x14xf32>
    %16 = tpu.matmul %14, %15, %cst_12 {dimension_numbers = #tpu.dot_dimension_numbers<[1], [0], [0], [1], [0, 0, 1, 1], [], []>} : vector<32x4xf32>, vector<4x14xf32>, vector<32x14xf32> -> vector<32x14xf32>
    %17 = arith.addf %12, %16 : vector<32x14xf32>
    %c0_13 = arith.constant 0 : index
    %c0_14 = arith.constant 0 : index
    %18 = vector.load %arg4[%c0_13, %c0_14] : memref<32x1xf32, #tpu.memory_space<vmem>>, vector<32x1xf32>
    %19 = vector.broadcast %18 : vector<32x1xf32> to vector<32x14xf32>
    %20 = arith.addf %17, %19 : vector<32x14xf32>
    %cst_15 = arith.constant 0.000000e+00 : f32
    %21 = vector.broadcast %cst_15 : f32 to vector<32x14xf32>
    %22 = arith.maximumf %20, %21 : vector<32x14xf32>
    %c0_16 = arith.constant 0 : index
    %c0_17 = arith.constant 0 : index
    %c0_18 = arith.constant 0 : index
    %23 = vector.load %arg5[%c0_16, %c0_17, %c0_18] : memref<1x32x14xf32, #tpu.memory_space<vmem>>, vector<1x32x14xf32>
    %24 = vector.shape_cast %23 : vector<1x32x14xf32> to vector<32x14xf32>
    %25 = vector.shape_cast %22 : vector<32x14xf32> to vector<1x32x14xf32>
    tpu.vector_store %arg5[%c0_16, %c0_17, %c0_18], %25 {strides = array<i32>} : memref<1x32x14xf32, #tpu.memory_space<vmem>>, vector<1x32x14xf32>,
    return
  }
  func.func @transform_0(%arg0: i32, %arg1: i32) -> (i32, i32, i32, i32) {
    %c0_i32 = arith.constant 0 : i32
    %c0_i32_0 = arith.constant 0 : i32
    %c0_i32_1 = arith.constant 0 : i32
    return %arg0, %arg1, %c0_i32, %c0_i32_0 : i32, i32, i32, i32
  }
  func.func @transform_1(%arg0: i32, %arg1: i32) -> (i32, i32, i32) {
    %c0_i32 = arith.constant 0 : i32
    %c0_i32_0 = arith.constant 0 : i32
    %c0_i32_1 = arith.constant 0 : i32
    %c0_i32_2 = arith.constant 0 : i32
    return %c0_i32, %c0_i32_0, %c0_i32_1 : i32, i32, i32
  }
  func.func @transform_2(%arg0: i32, %arg1: i32) -> (i32, i32) {
    %c0_i32 = arith.constant 0 : i32
    %c0_i32_0 = arith.constant 0 : i32
    %c0_i32_1 = arith.constant 0 : i32
    return %c0_i32, %c0_i32_0 : i32, i32
  }
  func.func @transform_3(%arg0: i32, %arg1: i32) -> (i32, i32, i32) {
    %c0_i32 = arith.constant 0 : i32
    %c0_i32_0 = arith.constant 0 : i32
    return %arg0, %c0_i32, %arg1 : i32, i32, i32
  }
}

</mosaic_0001>

<bundles_post_ra>
// kernel: tpu_custom_call.1
= control target key start
LH: loop header
LB: loop body
LE: loop exit
PB: predicated region body
PF: predicated region fallthrough
CT: control target
= control target key end

     0   :  { %s585_s12 = smov 0   ;;  %s587_s13 = smov 0   ;;  %s692_s0 = inlined_call_operand.vmem [shape: f32[2,1,4,16], index: 0, kind: input, shape index: {}]   ;;  %s693_s1 = inlined_call_operand.vmem [shape: f32[3,32,4], index: 1, kind: input, shape index: {}]   ;;  %s694_s2 = inlined_call_operand.vmem [shape: f32[32,1], index: 2, kind: input, shape index: {}]   ;;  %s695_s3 = inlined_call_operand.vmem [shape: f32[2,32,14], index: 3, kind: output, shape index: {}]  }
   0x1   :  { %s589_s14 = smov 0  }
   0x2 LB: > { %s25_s15 = sadd.s32 1, %s556_s13  ;;  %p475_p0 = scmp.ge.s32.totalorder %s560_s14, 1  ;;  %s560_s14 = sphi %s589_s14, %s13_s14   ;;  %s556_s13 = sphi %s587_s13, %s697_s13   ;;  %s552_s12 = sphi %s585_s12, %s696_s12  }
   0x3   : > { %p27_p1 = scmp.ge.s32.totalorder %s25_s15, 2  ;;  %p155_p2 = scmp.lt.s32.totalorder %s560_s14, 3 }
   0x5   : > { %s699_s15 = smov (%p27_p1, %s25_s15), 0  ;;  %p156_p3 = pnand %p475_p0, %p155_p2 }
   0x6   : > { %p184_p4 = scmp.lt.s32.totalorder (!%p156_p3), %s552_s12, 1  ;;  %s562_s20 = smov (!%p156_p3), 127  }
   0x7   : > { %159 = sbr.rel (%p156_p3) target bundleno = 295 (0x127), region = 32  ;;  %s563_s21 = smov (!%p156_p3), 126  }
   0xc   : > { %s701_s12 = smov (!%p184_p4, %s552_s12), 1  ;;  %vm225_vm0 = vcmask 1043456   ;;  %vm212_vm1 = vcmask 31744   ;;  %v201_v1 = vld [vmem:[%s693_s1 + $0x8] sm:$0xff]  ;;  %v354_v2 = vld [vmem:[%s694_s2] sm:$0xff]  ;;  %v202_v3 = vld [vmem:[%s693_s1 + $0x10] sm:$0xff] }
   0xd   : > { %s476_s16 = sshll.u32 %s701_s12, 2  ;;  %v564_v4 = vmov 0   ;;  %v355_v5 = vld [vmem:[%s694_s2 + $0x8] sm:$0xff]  ;;  %v203_v6 = vld [vmem:[%s693_s1 + $0x18] sm:$0xff]  ;;  %v356_v7 = vld [vmem:[%s694_s2 + $0x10] sm:$0xff]  ;;  %s504_s4 = sshll.u32 %s701_s12, 5 }
   0xe   : > { %s190_s19 = scalar_lea.vmem %s692_s0, %s476_s16  ;;  %535 = vset.pattern.permute.xlu1 %v564_v4  ;;  %536 = vset.pattern.permute.xlu2 %v564_v4  ;;  %v479_v8 = vld [vmem:[%s693_s1 + $0x20] sm:$0xff]  ;;  %v480_v9 = vld [vmem:[%s693_s1 + $0x28] sm:$0xff]  ;;  %v357_v11 = vld [vmem:[%s694_s2 + $0x18] sm:$0xff]  ;;  %s198_s7 = scalar_lea.vmem %s695_s3, %s504_s4  ;;  %vm386_vm2 = vcmask 113664  }
   0xf   : > { %v199_v0 = vld [vmem:[%s190_s19] sm:$0xf]  ;;  %360 = vperm.xlu1 %535, %v354_v2   ;;  %537 = vset.pattern.permute.xlu0 %v564_v4  ;;  %v494_v13 = vld [vmem:[%s693_s1 + $0x48] sm:$0xff]  ;;  %v481_v15 = vld [vmem:[%s693_s1 + $0x30] sm:$0xff] }
  0x10   : > { %210 = vrot.lane.b32.xlu0 %v199_v0, %s562_s20  ;;  %506 = vmatpush.msk.msra.mxu1 %vm225_vm0, %v199_v0  ;;  %v200_v12 = vld [vmem:[%s693_s1] sm:$0xff]  ;;  %v495_v17 = vld [vmem:[%s693_s1 + $0x50] sm:$0xff]  ;;  %v482_v18 = vld [vmem:[%s693_s1 + $0x38] sm:$0xff] }
  0x11   : > { %490 = vmatmul.msk.f32.vlgmr.msra.gmra.mxu1 %vm212_vm1, %v201_v1  ;;  %370 = vperm.xlu2 %536, %v356_v7   ;;  %v493_v16 = vld [vmem:[%s693_s1 + $0x40] sm:$0xff]  ;;  %v496_v19 = vld [vmem:[%s693_s1 + $0x58] sm:$0xff] }
  0x17   : > { %365 = vperm.xlu1 %535, %v355_v5  }
  0x18   : > { %305 = vrot.lane.b32.xlu0 %v199_v0, %s563_s21 }
  0x19   : > { %491 = vmatmul.msk.f32.gmra.mxu1 %vm212_vm1, %v202_v3  ;;  %375 = vperm.xlu2 %536, %v357_v11  }
  0x21   : > { %492 = vmatmul.msk.f32.gmra.mxu1 %vm212_vm1, %v203_v6 }
  0x6b   : > { %v371_v39 = vpop.permute.xlu2 %370 }
  0x73   : > { %v376_v49 = vpop.permute.xlu2 %375 }
  0x81   : > { %v361_v21 = vpop.permute.xlu1 %360 }
  0x82   : > { %v211_v10 = vpop.permute.xlu0 %210 }
  0x83   : > { %483 = vmatpush.msk.msra.mxu0 %vm225_vm0, %v211_v10  ;;  %505 = vmatpush.msk.msra.mxu3 %vm225_vm0, %v211_v10 }
  0x84   : > { %484 = vmatmul.msk.f32.vlgmr.msra.gmra.mxu0 %vm212_vm1, %v479_v8  ;;  %485 = vmatmul.msk.f32.vlgmr.msra.gmra.mxu3 %vm212_vm1, %v480_v9 }
  0x85   : > { %488 = vmatpush.msk.msrb.mxu0 %vm225_vm0, %v199_v0 }
  0x89   : > { %v366_v27 = vpop.permute.xlu1 %365 }
  0x8a   : > { %v306_v14 = vpop.permute.xlu0 %305 }
  0x8b   : > { %497 = vmatpush.msk.msra.mxu0 %vm225_vm0, %v306_v14  ;;  %507 = vmatpush.msk.msra.mxu2 %vm225_vm0, %v306_v14 }
  0x8c   : > { %489 = vmatmul.msk.f32.vlgmr.msrb.gmra.mxu0 %vm212_vm1, %v200_v12  ;;  %499 = vmatmul.msk.f32.vlgmr.msra.gmra.mxu2 %vm212_vm1, %v494_v13 }
  0x8d   : > { %486 = vmatmul.msk.f32.gmra.mxu3 %vm212_vm1, %v481_v15 }
  0x8e   : > { %v291_v22 = vpop.f32.mrf.mxu1 }
  0x94   : > { %498 = vmatmul.msk.f32.vlgmr.msra.gmra.mxu0 %vm212_vm1, %v493_v16  ;;  %500 = vmatmul.msk.f32.gmra.mxu2 %vm212_vm1, %v495_v17 }
  0x95   : > { %487 = vmatmul.msk.f32.gmra.mxu3 %vm212_vm1, %v482_v18 }
  0x96   : > { %v294_v29 = vpop.f32.mrf.mxu1 }
  0x9c   : > { %501 = vmatmul.msk.f32.gmra.mxu2 %vm212_vm1, %v496_v19 }
  0x9e   : > { %v297_v43 = vpop.f32.mrf.mxu1 }
 0x101   : > { %v245_v20 = vpop.f32.mrf.mxu0 }
 0x107   : > { %v248_v23 = vpop.f32.mrf.mxu3 }
 0x108   : > { %v292_v25 = vadd.f32 %v291_v22, %v248_v23 }
 0x109   : > { %v288_v24 = vpop.f32.mrf.mxu0 }
 0x10a   : > { %v289_v26 = vadd.f32 %v288_v24, %v245_v20 }
 0x10f   : > { %v341_v28 = vpop.f32.mrf.mxu2 }
 0x110   : > { %v351_v30 = vadd.f32 %v341_v28, %v292_v25  ;;  %v251_v31 = vpop.f32.mrf.mxu3 }
 0x111   : > { %v338_v32 = vpop.f32.mrf.mxu0  ;;  %v295_v37 = vadd.f32 %v294_v29, %v251_v31 }
 0x112   : > { %v379_v33 = vadd.f32 %v366_v27, %v351_v30  ;;  %v350_v34 = vadd.f32 %v338_v32, %v289_v26 }
 0x114   : > { %v383_v35 = vmax.f32 %v379_v33, 0.0  ;;  %v378_v36 = vadd.f32 %v361_v21, %v350_v34 }
 0x116   : > { %388 = vst.msk [vmem:[%s198_s7 + $0x8] sm:$0xff] %vm386_vm2, %v383_v35  ;;  %v382_v38 = vmax.f32 %v378_v36, 0.0 }
 0x117   : > { %v344_v40 = vpop.f32.mrf.mxu2 }
 0x118   : > { %387 = vst.msk [vmem:[%s198_s7] sm:$0xff] %vm386_vm2, %v382_v38  ;;  %v352_v41 = vadd.f32 %v344_v40, %v295_v37  ;;  %v254_v42 = vpop.f32.mrf.mxu3 }
 0x119   : > { %v298_v46 = vadd.f32 %v297_v43, %v254_v42 }
 0x11a   : > { %v380_v44 = vadd.f32 %v371_v39, %v352_v41 }
 0x11c   : > { %v384_v45 = vmax.f32 %v380_v44, 0.0 }
 0x11e   : > { %389 = vst.msk [vmem:[%s198_s7 + $0x10] sm:$0xff] %vm386_vm2, %v384_v45 }
 0x11f   : > { %v347_v47 = vpop.f32.mrf.mxu2 }
 0x120   : > { %v353_v48 = vadd.f32 %v347_v47, %v298_v46 }
 0x122   : > { %v381_v50 = vadd.f32 %v376_v49, %v353_v48 }
 0x124   : > { %v385_v51 = vmax.f32 %v381_v50, 0.0 }
 0x126   : > { %390 = vst.msk [vmem:[%s198_s7 + $0x18] sm:$0xff] %vm386_vm2, %v385_v51 }
 0x127 PF: > { %s13_s14 = sadd.s32 1, %s560_s14   ;;  %s696_s12 = smov %s556_s13 }
 0x128   : > { %p10_p5 = scmp.ge.s32.totalorder %s13_s14, 4   ;;  %s697_s13 = smov %s699_s15 }
 0x12a   :  { %12 = sbr.rel (!%p10_p5) target bundleno = 2 (0x2), region = 64 }

</bundles_post_ra>
